<compile_context>
chip_gen: v7x
topology: tpu7x:2x2x1
jax: 0.10.0
libtpu: 0.0.40
codegen_flags: <defaults>
</compile_context>

<pallas_src>
import numpy as np
import jax
import jax.numpy as jnp
from jax.experimental import pallas as pl
from jax.experimental.pallas import tpu as pltpu


def _round_up(v, m=128):
    return ((v + m - 1) // m) * m


def gcn_fused_kernel(a_ref, x_ref, w1t_ref, w2t_ref, out_ref, h_ref):
    """Fused 2-layer GCN:  out = A @ relu(A @ (x @ W1^T)) @ W2^T  (all MXU)."""
    # ---- layer 1: dense linear (MXU) -------------------------------------
    xw = jnp.dot(x_ref[...], w1t_ref[...], preferred_element_type=jnp.float32)
    # ---- layer 1: aggregation as dense MXU matmul + block-wide ReLU ------
    h_ref[...] = jnp.maximum(
        jnp.dot(a_ref[...], xw, preferred_element_type=jnp.float32), 0.0)
    # ---- layer 2: dense linear (MXU) -------------------------------------
    hw = jnp.dot(h_ref[...], w2t_ref[...], preferred_element_type=jnp.float32)
    # ---- layer 2: aggregation (MXU), lane-dense store --------------------
    out_ref[...] = jnp.dot(a_ref[...], hw, preferred_element_type=jnp.float32)


@jax.jit
def gcn_forward(indptr, indices, vals, x, w1, w2):
    """indptr [N+1] i32, indices [nnz] i32, vals [nnz] f32 (CSR of the
    normalized adjacency); x [N, IN]; w1 [HID, IN]; w2 [OUT, HID]
    (torch.nn.Linear layout, no bias)."""
    n = indptr.shape[0] - 1
    f_in = x.shape[1]
    hid = w1.shape[0]
    f_out = w2.shape[0]

    n_p = _round_up(n)
    f_in_p = _round_up(f_in)
    hid_p = _round_up(hid)
    f_out_p = _round_up(f_out)

    # Densify the CSR adjacency into a zero-padded (n_p, n_p) tile so the
    # spmm_sum can run as a single MXU matmul inside the kernel.
    nnz = indices.shape[0]
    rows = jnp.repeat(jnp.arange(n, dtype=jnp.int32), jnp.diff(indptr),
                      total_repeat_length=nnz)
    a_dense = jnp.zeros((n_p, n_p), jnp.float32).at[rows, indices].add(vals)

    # Zero-pad all operands to MXU / lane friendly (multiples of 128) shapes.
    x_p = jnp.zeros((n_p, f_in_p), jnp.float32).at[:n, :f_in].set(x)
    w1t_p = jnp.zeros((f_in_p, hid_p), jnp.float32).at[:f_in, :hid].set(w1.T)
    w2t_p = jnp.zeros((hid_p, f_out_p), jnp.float32).at[:hid, :f_out].set(w2.T)

    out_p = pl.pallas_call(
        gcn_fused_kernel,
        out_shape=jax.ShapeDtypeStruct((n_p, f_out_p), jnp.float32),
        in_specs=[
            pl.BlockSpec(memory_space=pltpu.MemorySpace.VMEM),  # A (dense)
            pl.BlockSpec(memory_space=pltpu.MemorySpace.VMEM),  # x
            pl.BlockSpec(memory_space=pltpu.MemorySpace.VMEM),  # W1^T
            pl.BlockSpec(memory_space=pltpu.MemorySpace.VMEM),  # W2^T
        ],
        out_specs=pl.BlockSpec(memory_space=pltpu.MemorySpace.VMEM),
        scratch_shapes=[pltpu.VMEM((n_p, hid_p), jnp.float32)],  # hidden h
    )(a_dense, x_p, w1t_p, w2t_p)

    return out_p[:n, :f_out]


if __name__ == "__main__":
    N, IN, HID, OUT = 32, 16, 32, 8

    key = jax.random.PRNGKey(0)
    kx, k1, k2 = jax.random.split(key, 3)
    x = jax.random.normal(kx, (N, IN), dtype=jnp.float32)
    # torch.nn.Linear weight shapes: [out_features, in_features], no bias.
    w1 = jax.random.normal(k1, (HID, IN), dtype=jnp.float32) * 0.1
    w2 = jax.random.normal(k2, (OUT, HID), dtype=jnp.float32) * 0.1

    # Deterministic normalized adjacency (ring graph + self loops) in CSR.
    rows, cols, vv = [], [], []
    for i in range(N):
        nbrs = sorted({(i - 1) % N, i, (i + 1) % N})
        for j in nbrs:
            rows.append(i)
            cols.append(j)
            vv.append(1.0 / len(nbrs))
    rows_np = np.array(rows, np.int32)
    cols_np = np.array(cols, np.int32)
    vals_np = np.array(vv, np.float32)
    indptr_np = np.zeros(N + 1, np.int64)
    np.add.at(indptr_np, rows_np + 1, 1)
    indptr_np = np.cumsum(indptr_np).astype(np.int32)

    out = gcn_forward(jnp.asarray(indptr_np), jnp.asarray(cols_np),
                      jnp.asarray(vals_np), x, w1, w2)
    out = jax.block_until_ready(out)

    # Dense JAX reference of the same forward pass.
    A = jnp.zeros((N, N), jnp.float32).at[rows_np, cols_np].set(vals_np)
    h_ref = jnp.maximum(A @ (x @ w1.T), 0.0)
    ref = A @ (h_ref @ w2.T)

    np.testing.assert_allclose(np.asarray(out), np.asarray(ref),
                               rtol=1e-4, atol=1e-4)
    print("KERNEL_OK")
</pallas_src>

<mosaic_0001>
module attributes {stable_mosaic.version = 11 : i64} {
  func.func private @main(%arg0: i32) attributes {dimension_semantics = [#tpu.dimension_semantics<core_parallel>], iteration_bounds = array<i64: 2>, tpu.core_type = #tpu.core_type<sc_scalar_subcore>, window_params = []} {
    return
  }
}

module attributes {stable_mosaic.version = 11 : i64} {
  func.func private @main(%arg0: i32) attributes {dimension_semantics = [#tpu.dimension_semantics<core_parallel>], iteration_bounds = array<i64: 2>, tpu.core_type = #tpu.core_type<sc_scalar_subcore>, window_params = []} {
    return
  }
}

module attributes {stable_mosaic.version = 11 : i64} {
  func.func @gcn_fused_kernel(%arg0: memref<128x128xf32, #tpu.memory_space<vmem>>, %arg1: memref<128x128xf32, #tpu.memory_space<vmem>>, %arg2: memref<128x128xf32, #tpu.memory_space<vmem>>, %arg3: memref<128x128xf32, #tpu.memory_space<vmem>>, %arg4: memref<128x128xf32, #tpu.memory_space<vmem>>, %arg5: memref<128x128xf32, #tpu.memory_space<vmem>>) attributes {dimension_semantics = [], scalar_prefetch = 0 : i64, scratch_operands = 1 : i64, tpu.core_type = #tpu.core_type<tc>} {
    %c0 = arith.constant 0 : index
    %c0_0 = arith.constant 0 : index
    %0 = vector.load %arg1[%c0, %c0_0] : memref<128x128xf32, #tpu.memory_space<vmem>>, vector<128x128xf32>
    %c0_1 = arith.constant 0 : index
    %c0_2 = arith.constant 0 : index
    %1 = vector.load %arg2[%c0_1, %c0_2] : memref<128x128xf32, #tpu.memory_space<vmem>>, vector<128x128xf32>
    %cst = arith.constant dense<0.000000e+00> : vector<128x128xf32>
    %2 = tpu.matmul %0, %1, %cst {dimension_numbers = #tpu.dot_dimension_numbers<[1], [0], [0], [1], [0, 0, 1, 1], [], []>} : vector<128x128xf32>, vector<128x128xf32>, vector<128x128xf32> -> vector<128x128xf32>
    %c0_3 = arith.constant 0 : index
    %c0_4 = arith.constant 0 : index
    %3 = vector.load %arg0[%c0_3, %c0_4] : memref<128x128xf32, #tpu.memory_space<vmem>>, vector<128x128xf32>
    %cst_5 = arith.constant dense<0.000000e+00> : vector<128x128xf32>
    %4 = tpu.matmul %3, %2, %cst_5 {dimension_numbers = #tpu.dot_dimension_numbers<[1], [0], [0], [1], [0, 0, 1, 1], [], []>} : vector<128x128xf32>, vector<128x128xf32>, vector<128x128xf32> -> vector<128x128xf32>
    %cst_6 = arith.constant 0.000000e+00 : f32
    %5 = vector.broadcast %cst_6 : f32 to vector<128x128xf32>
    %6 = arith.maximumf %4, %5 : vector<128x128xf32>
    %c0_7 = arith.constant 0 : index
    %c0_8 = arith.constant 0 : index
    %7 = vector.load %arg5[%c0_7, %c0_8] : memref<128x128xf32, #tpu.memory_space<vmem>>, vector<128x128xf32>
    tpu.vector_store %arg5[%c0_7, %c0_8], %6 {strides = array<i32>} : memref<128x128xf32, #tpu.memory_space<vmem>>, vector<128x128xf32>,
    %c0_9 = arith.constant 0 : index
    %c0_10 = arith.constant 0 : index
    %8 = vector.load %arg5[%c0_9, %c0_10] : memref<128x128xf32, #tpu.memory_space<vmem>>, vector<128x128xf32>
    %c0_11 = arith.constant 0 : index
    %c0_12 = arith.constant 0 : index
    %9 = vector.load %arg3[%c0_11, %c0_12] : memref<128x128xf32, #tpu.memory_space<vmem>>, vector<128x128xf32>
    %cst_13 = arith.constant dense<0.000000e+00> : vector<128x128xf32>
    %10 = tpu.matmul %8, %9, %cst_13 {dimension_numbers = #tpu.dot_dimension_numbers<[1], [0], [0], [1], [0, 0, 1, 1], [], []>} : vector<128x128xf32>, vector<128x128xf32>, vector<128x128xf32> -> vector<128x128xf32>
    %c0_14 = arith.constant 0 : index
    %c0_15 = arith.constant 0 : index
    %11 = vector.load %arg0[%c0_14, %c0_15] : memref<128x128xf32, #tpu.memory_space<vmem>>, vector<128x128xf32>
    %cst_16 = arith.constant dense<0.000000e+00> : vector<128x128xf32>
    %12 = tpu.matmul %11, %10, %cst_16 {dimension_numbers = #tpu.dot_dimension_numbers<[1], [0], [0], [1], [0, 0, 1, 1], [], []>} : vector<128x128xf32>, vector<128x128xf32>, vector<128x128xf32> -> vector<128x128xf32>
    %c0_17 = arith.constant 0 : index
    %c0_18 = arith.constant 0 : index
    %13 = vector.load %arg4[%c0_17, %c0_18] : memref<128x128xf32, #tpu.memory_space<vmem>>, vector<128x128xf32>
    tpu.vector_store %arg4[%c0_17, %c0_18], %12 {strides = array<i32>} : memref<128x128xf32, #tpu.memory_space<vmem>>, vector<128x128xf32>,
    return
  }
}

</mosaic_0001>

<bundles_post_ra>
// kernel: gcn_forward.1
= control target key start
LH: loop header
LB: loop body
LE: loop exit
PB: predicated region body
PF: predicated region fallthrough
CT: control target
= control target key end

     0   :  { %9 = vsyncpa [#allocation4], 0  ;;  %s1267_s15 = smov [#allocation3]   ;;  %s1563_s0 = inlined_call_operand.hbm [shape: f32[128,128], index: 0, kind: input, shape index: {}]   ;;  %s1564_s1 = inlined_call_operand.vmem [shape: f32[128,128], index: 1, kind: input, shape index: {}]   ;;  %s1565_s2 = inlined_call_operand.vmem [shape: f32[128,128], index: 2, kind: input, shape index: {}]   ;;  %s1566_s3 = inlined_call_operand.vmem [shape: f32[128,128], index: 3, kind: input, shape index: {}]   ;;  %s1567_s4 = inlined_call_operand.vmem [shape: f32[128,128], index: 4, kind: output, shape index: {}]  }
   0x1   :  { %s15_s16 = sshll.u32 %s1267_s15, 4  ;;  %s1243_s19 = scalar_lea.hbm %s1563_s0, 2048  ;;  %s16_s16 = int_to_ptr.vmem [resolvable:$true] %s15_s16 }
   0x2   :  { %p1244_p0 = scmp.ne.s32.totalorder %s1563_s0, %s1243_s19  ;;  %p1247_p1 = scmp.lt.u32.totalorder %s1243_s19, %s1563_s0 }
   0x4   :  { %p1249_p2 = pnand %p1247_p1, %p1244_p0 }
   0x6   :  { %1252 = shalt.err (!%p1249_p2)
}
   0x7   :  { %s1253_s24 = scalar_lea.vmem %s16_s16, 2048  ;;  %p1258_p4 = scmp.lt.s32.totalorder %s16_s16, %s16_s16 }
   0x8   :  { %p1254_p3 = scmp.ne.s32.totalorder %s16_s16, %s1253_s24  ;;  %p1259_p5 = scmp.lt.s32.totalorder %s1253_s24, %s1253_s24 }
   0xa   :  { %p1260_p6 = por %p1259_p5, %p1258_p4 }
   0xc   :  { %p1261_p7 = pnand %p1260_p6, %p1254_p3 }
   0xe   :  { %1264 = shalt.err (!%p1261_p7)
}
   0xf   :  { %s1268_s25 = smov 128   ;;  %s1269_s26 = smov 8  }
  0x10   :  { %21 = dma.hbm_to_vmem [thread:$0]  %s1563_s0, 2048, %s16_s16, [#allocation4], %s1268_s25, %s1268_s25, %s1269_s26  }
  0x11   :  { %1265 = dma.done.wait [#allocation4], 2048  }
  0x12   :  { %1266 = vsyncadd [#allocation4], 4294965248  ;;  %v47_v0 = vld [vmem:[%s1565_s2] sm:$0xff]  ;;  %v48_v1 = vld [vmem:[%s1565_s2 + $0x8] sm:$0xff] }
  0x13   :  { %v49_v2 = vld [vmem:[%s1565_s2 + $0x10] sm:$0xff]  ;;  %v1112_v3 = vpack.c.bf16 %v48_v1, %v47_v0  ;;  %v50_v4 = vld [vmem:[%s1565_s2 + $0x18] sm:$0xff]  ;;  %v51_v6 = vld [vmem:[%s1565_s2 + $0x20] sm:$0xff] }
  0x14   :  { %v1116_v5 = vpack.c.bf16 %v50_v4, %v49_v2  ;;  %v52_v7 = vld [vmem:[%s1565_s2 + $0x28] sm:$0xff]  ;;  %v31_v9 = vld [vmem:[%s1564_s1] sm:$0xff]  ;;  %v53_v10 = vld [vmem:[%s1565_s2 + $0x30] sm:$0xff] }
  0x15   :  { %1113 = vmatprep.subr.bf16.mxu0 %v1112_v3  ;;  %v1120_v8 = vpack.c.bf16 %v52_v7, %v51_v6  ;;  %v54_v11 = vld [vmem:[%s1565_s2 + $0x38] sm:$0xff]  ;;  %920 = vmatprep.mubr.f32.mxu0 %v31_v9  ;;  %v55_v13 = vld [vmem:[%s1565_s2 + $0x40] sm:$0xff]  ;;  %v56_v14 = vld [vmem:[%s1565_s2 + $0x48] sm:$0xff] }
  0x16   :  { %1115 = vmatpush3.bf16.msra.mxu0 %v1112_v3  ;;  %v1124_v12 = vpack.c.bf16 %v54_v11, %v53_v10  ;;  %v1128_v15 = vpack.c.bf16 %v56_v14, %v55_v13  ;;  %v57_v16 = vld [vmem:[%s1565_s2 + $0x50] sm:$0xff]  ;;  %v58_v17 = vld [vmem:[%s1565_s2 + $0x58] sm:$0xff]  ;;  %v59_v19 = vld [vmem:[%s1565_s2 + $0x60] sm:$0xff] }
  0x17   :  { %1117 = vmatprep.subr.bf16.mxu0 %v1116_v5  ;;  %v1132_v18 = vpack.c.bf16 %v58_v17, %v57_v16  ;;  %v60_v20 = vld [vmem:[%s1565_s2 + $0x68] sm:$0xff]  ;;  %v61_v22 = vld [vmem:[%s1565_s2 + $0x70] sm:$0xff]  ;;  %v62_v23 = vld [vmem:[%s1565_s2 + $0x78] sm:$0xff] }
  0x18   :  { %v1136_v21 = vpack.c.bf16 %v60_v20, %v59_v19  ;;  %v1140_v24 = vpack.c.bf16 %v62_v23, %v61_v22  ;;  %v32_v25 = vld [vmem:[%s1564_s1 + $0x8] sm:$0xff]  ;;  %v33_v26 = vld [vmem:[%s1564_s1 + $0x10] sm:$0xff]  ;;  %v34_v27 = vld [vmem:[%s1564_s1 + $0x18] sm:$0xff] }
  0x19   :  { %v35_v28 = vld [vmem:[%s1564_s1 + $0x20] sm:$0xff]  ;;  %v36_v29 = vld [vmem:[%s1564_s1 + $0x28] sm:$0xff]  ;;  %v37_v30 = vld [vmem:[%s1564_s1 + $0x30] sm:$0xff] }
  0x1a   :  { %1119 = vmatpush3.bf16.msra.mxu0 %v1116_v5  ;;  %v38_v31 = vld [vmem:[%s1564_s1 + $0x38] sm:$0xff]  ;;  %v39_v32 = vld [vmem:[%s1564_s1 + $0x40] sm:$0xff]  ;;  %v40_v33 = vld [vmem:[%s1564_s1 + $0x48] sm:$0xff] }
  0x1b   :  { %1121 = vmatprep.subr.bf16.mxu0 %v1120_v8  ;;  %v41_v34 = vld [vmem:[%s1564_s1 + $0x50] sm:$0xff]  ;;  %v42_v35 = vld [vmem:[%s1564_s1 + $0x58] sm:$0xff]  ;;  %v43_v36 = vld [vmem:[%s1564_s1 + $0x60] sm:$0xff] }
  0x1c   :  { %v44_v37 = vld [vmem:[%s1564_s1 + $0x68] sm:$0xff]  ;;  %v45_v38 = vld [vmem:[%s1564_s1 + $0x70] sm:$0xff]  ;;  %v46_v39 = vld [vmem:[%s1564_s1 + $0x78] sm:$0xff] }
  0x1d   :  { %v1403_v40 = vld [vmem:[#allocation3] sm:$0xff]  ;;  %v418_v42 = vld [vmem:[%s1566_s3 + $0x8] sm:$0xff]  ;;  %v419_v43 = vld [vmem:[%s1566_s3 + $0x10] sm:$0xff] }
  0x1e   :  { %1123 = vmatpush3.bf16.msra.mxu0 %v1120_v8  ;;  %976 = vmatprep.mubr.f32.mxu1 %v1403_v40  ;;  %v417_v41 = vld [vmem:[%s1566_s3] sm:$0xff]  ;;  %v420_v45 = vld [vmem:[%s1566_s3 + $0x18] sm:$0xff]  ;;  %v422_v48 = vld [vmem:[%s1566_s3 + $0x28] sm:$0xff] }
  0x1f   :  { %1125 = vmatprep.subr.bf16.mxu0 %v1124_v12  ;;  %v1176_v44 = vpack.c.bf16 %v418_v42, %v417_v41  ;;  %v1180_v46 = vpack.c.bf16 %v420_v45, %v419_v43  ;;  %v421_v47 = vld [vmem:[%s1566_s3 + $0x20] sm:$0xff]  ;;  %v423_v50 = vld [vmem:[%s1566_s3 + $0x30] sm:$0xff]  ;;  %v424_v51 = vld [vmem:[%s1566_s3 + $0x38] sm:$0xff] }
  0x20   :  { %v1184_v49 = vpack.c.bf16 %v422_v48, %v421_v47  ;;  %v1188_v52 = vpack.c.bf16 %v424_v51, %v423_v50  ;;  %v425_v53 = vld [vmem:[%s1566_s3 + $0x40] sm:$0xff]  ;;  %v426_v54 = vld [vmem:[%s1566_s3 + $0x48] sm:$0xff]  ;;  %v427_v56 = vld [vmem:[%s1566_s3 + $0x50] sm:$0xff] }
  0x21   :  { %v1192_v55 = vpack.c.bf16 %v426_v54, %v425_v53  ;;  %v428_v57 = vld [vmem:[%s1566_s3 + $0x58] sm:$0xff]  ;;  %v429_v59 = vld [vmem:[%s1566_s3 + $0x60] sm:$0xff]  ;;  %v430_v60 = vld [vmem:[%s1566_s3 + $0x68] sm:$0xff] }
  0x22   :  { %1127 = vmatpush3.bf16.msra.mxu0 %v1124_v12  ;;  %v1196_v58 = vpack.c.bf16 %v428_v57, %v427_v56  ;;  %v1200_v61 = vpack.c.bf16 %v430_v60, %v429_v59  ;;  %v1448_v22 = vld [vmem:[#allocation3 + $0x8] sm:$0xff]  ;;  %v1450_v23 = vld [vmem:[#allocation3 + $0x10] sm:$0xff] }
  0x23   :  { %1129 = vmatprep.subr.bf16.mxu0 %v1128_v15 }
  0x26   :  { %1131 = vmatpush3.bf16.msra.mxu0 %v1128_v15 }
  0x27   :  { %1133 = vmatprep.subr.bf16.mxu0 %v1132_v18 }
  0x2a   :  { %1135 = vmatpush3.bf16.msra.mxu0 %v1132_v18 }
  0x2b   :  { %1137 = vmatprep.subr.bf16.mxu0 %v1136_v21 }
  0x2e   :  { %1139 = vmatpush3.bf16.msra.mxu0 %v1136_v21 }
  0x2f   :  { %1141 = vmatprep.subr.bf16.mxu0 %v1140_v24 }
  0x32   :  { %1143 = vmatpush3.bf16.msra.mxu0 %v1140_v24  ;;  %v1454_v24 = vld [vmem:[#allocation3 + $0x18] sm:$0xff] }
  0x33   :  { %1177 = vmatprep.subr.bf16.mxu0 %v1176_v44 }
  0x35   :  { %921 = vmatmul.mubr.f32.vlgmr.msra.gmra.mrb[0].mxu0 %v32_v25  ;;  %v1456_v25 = vld [vmem:[#allocation3 + $0x20] sm:$0xff] }
  0x36   :  { %923 = vmatprep.mubr.f32.mxu0 %v33_v26  ;;  %1179 = vmatpush3.bf16.msra.mxu0 %v1176_v44  ;;  %v1460_v26 = vld [vmem:[#allocation3 + $0x28] sm:$0xff] }
  0x37   :  { %1181 = vmatprep.subr.bf16.mxu0 %v1180_v46 }
  0x39   :  { %924 = vmatmul.mubr.f32.gmra.mrb[2].mxu0 %v34_v27  ;;  %v1462_v27 = vld [vmem:[#allocation3 + $0x30] sm:$0xff] }
  0x3a   :  { %926 = vmatprep.mubr.f32.mxu0 %v35_v28  ;;  %1183 = vmatpush3.bf16.msra.mxu0 %v1180_v46  ;;  %v1466_v28 = vld [vmem:[#allocation3 + $0x38] sm:$0xff] }
  0x3b   :  { %1185 = vmatprep.subr.bf16.mxu0 %v1184_v49 }
  0x3d   :  { %927 = vmatmul.mubr.f32.gmra.mrb[4].mxu0 %v36_v29  ;;  %v1468_v29 = vld [vmem:[#allocation3 + $0x40] sm:$0xff] }
  0x3e   :  { %929 = vmatprep.mubr.f32.mxu0 %v37_v30  ;;  %1187 = vmatpush3.bf16.msra.mxu0 %v1184_v49  ;;  %v1472_v30 = vld [vmem:[#allocation3 + $0x48] sm:$0xff] }
  0x3f   :  { %1189 = vmatprep.subr.bf16.mxu0 %v1188_v52 }
  0x41   :  { %930 = vmatmul.mubr.f32.gmra.mrb[6].mxu0 %v38_v31  ;;  %v1474_v31 = vld [vmem:[#allocation3 + $0x50] sm:$0xff] }
  0x42   :  { %932 = vmatprep.mubr.f32.mxu0 %v39_v32  ;;  %1191 = vmatpush3.bf16.msra.mxu0 %v1188_v52  ;;  %v1478_v32 = vld [vmem:[#allocation3 + $0x58] sm:$0xff] }
  0x43   :  { %1193 = vmatprep.subr.bf16.mxu0 %v1192_v55 }
  0x45   :  { %933 = vmatmul.mubr.f32.gmra.mrb[8].mxu0 %v40_v33  ;;  %v1480_v33 = vld [vmem:[#allocation3 + $0x60] sm:$0xff] }
  0x46   :  { %935 = vmatprep.mubr.f32.mxu0 %v41_v34  ;;  %1195 = vmatpush3.bf16.msra.mxu0 %v1192_v55  ;;  %v1484_v34 = vld [vmem:[#allocation3 + $0x68] sm:$0xff] }
  0x47   :  { %1197 = vmatprep.subr.bf16.mxu0 %v1196_v58 }
  0x49   :  { %936 = vmatmul.mubr.f32.gmra.mrb[10].mxu0 %v42_v35  ;;  %v1486_v35 = vld [vmem:[#allocation3 + $0x70] sm:$0xff] }
  0x4a   :  { %938 = vmatprep.mubr.f32.mxu0 %v43_v36  ;;  %1199 = vmatpush3.bf16.msra.mxu0 %v1196_v58  ;;  %v1490_v36 = vld [vmem:[#allocation3 + $0x78] sm:$0xff] }
  0x4b   :  { %1201 = vmatprep.subr.bf16.mxu0 %v1200_v61 }
  0x4d   :  { %939 = vmatmul.mubr.f32.gmra.mrb[12].mxu0 %v44_v37  ;;  %v431_v37 = vld [vmem:[%s1566_s3 + $0x70] sm:$0xff] }
  0x4e   :  { %941 = vmatprep.mubr.f32.mxu0 %v45_v38  ;;  %1203 = vmatpush3.bf16.msra.mxu0 %v1200_v61  ;;  %v432_v38 = vld [vmem:[%s1566_s3 + $0x78] sm:$0xff] }
  0x51   :  { %942 = vmatmul.mubr.f32.gmra.mrb[14].mxu0 %v46_v39  ;;  %v1204_v39 = vpack.c.bf16 %v432_v38, %v431_v37 }
  0x53   :  { %1205 = vmatprep.subr.bf16.mxu0 %v1204_v39 }
  0x54   :  { %1207 = vmatpush3.bf16.msra.mxu0 %v1204_v39 }
 0x108   :  { %v922_v62 = vpop.f32.mrb[0].mxu0 }
 0x109   :  { %v129_v63 = vpop.f32.mrb[1].mxu0 }
 0x10a   :  { %v1144_v0 = vpack.c.bf16 %v922_v62, %v129_v63 }
 0x10c   :  { %v925_v1 = vpop.f32.mrb[2].mxu0  ;;  %1145 = vmatprep.subr.bf16.mxu1 %v1144_v0 }
 0x10d   :  { %v139_v2 = vpop.f32.mrb[3].mxu0  ;;  %1147 = vmatpush3.bf16.msra.mxu1 %v1144_v0 }
 0x10e   :  { %v1148_v3 = vpack.c.bf16 %v925_v1, %v139_v2 }
 0x110   :  { %v928_v4 = vpop.f32.mrb[4].mxu0  ;;  %1149 = vmatprep.subr.bf16.mxu1 %v1148_v3 }
 0x111   :  { %v149_v5 = vpop.f32.mrb[5].mxu0  ;;  %1151 = vmatpush3.bf16.msra.mxu1 %v1148_v3 }
 0x112   :  { %v1152_v6 = vpack.c.bf16 %v928_v4, %v149_v5 }
 0x114   :  { %v931_v7 = vpop.f32.mrb[6].mxu0  ;;  %1153 = vmatprep.subr.bf16.mxu1 %v1152_v6 }
 0x115   :  { %v159_v8 = vpop.f32.mrb[7].mxu0  ;;  %1155 = vmatpush3.bf16.msra.mxu1 %v1152_v6 }
 0x116   :  { %v1156_v9 = vpack.c.bf16 %v931_v7, %v159_v8 }
 0x118   :  { %v934_v10 = vpop.f32.mrb[8].mxu0  ;;  %1157 = vmatprep.subr.bf16.mxu1 %v1156_v9 }
 0x119   :  { %v169_v11 = vpop.f32.mrb[9].mxu0  ;;  %1159 = vmatpush3.bf16.msra.mxu1 %v1156_v9 }
 0x11a   :  { %v1160_v12 = vpack.c.bf16 %v934_v10, %v169_v11 }
 0x11c   :  { %v937_v13 = vpop.f32.mrb[10].mxu0  ;;  %1161 = vmatprep.subr.bf16.mxu1 %v1160_v12 }
 0x11d   :  { %v179_v14 = vpop.f32.mrb[11].mxu0  ;;  %1163 = vmatpush3.bf16.msra.mxu1 %v1160_v12 }
 0x11e   :  { %v1164_v15 = vpack.c.bf16 %v937_v13, %v179_v14 }
 0x120   :  { %v940_v16 = vpop.f32.mrb[12].mxu0  ;;  %1165 = vmatprep.subr.bf16.mxu1 %v1164_v15 }
 0x121   :  { %v189_v17 = vpop.f32.mrb[13].mxu0  ;;  %1167 = vmatpush3.bf16.msra.mxu1 %v1164_v15 }
 0x122   :  { %v1168_v18 = vpack.c.bf16 %v940_v16, %v189_v17 }
 0x124   :  { %v943_v19 = vpop.f32.mrb[14].mxu0  ;;  %1169 = vmatprep.subr.bf16.mxu1 %v1168_v18 }
 0x125   :  { %v199_v20 = vpop.f32.mrb[15].mxu0  ;;  %1171 = vmatpush3.bf16.msra.mxu1 %v1168_v18 }
 0x126   :  { %v1172_v21 = vpack.c.bf16 %v943_v19, %v199_v20 }
 0x128   :  { %1173 = vmatprep.subr.bf16.mxu1 %v1172_v21 }
 0x129   :  { %1175 = vmatpush3.bf16.msra.mxu1 %v1172_v21 }
 0x12c   :  { %977 = vmatmul.mubr.f32.vlgmr.msra.gmra.mrb[0].mxu1 %v1448_v22 }
 0x12d   :  { %979 = vmatprep.mubr.f32.mxu1 %v1450_v23 }
 0x130   :  { %980 = vmatmul.mubr.f32.gmra.mrb[2].mxu1 %v1454_v24 }
 0x131   :  { %982 = vmatprep.mubr.f32.mxu1 %v1456_v25 }
 0x134   :  { %983 = vmatmul.mubr.f32.gmra.mrb[4].mxu1 %v1460_v26 }
 0x135   :  { %985 = vmatprep.mubr.f32.mxu1 %v1462_v27 }
 0x138   :  { %986 = vmatmul.mubr.f32.gmra.mrb[6].mxu1 %v1466_v28 }
 0x139   :  { %988 = vmatprep.mubr.f32.mxu1 %v1468_v29 }
 0x13c   :  { %989 = vmatmul.mubr.f32.gmra.mrb[8].mxu1 %v1472_v30 }
 0x13d   :  { %991 = vmatprep.mubr.f32.mxu1 %v1474_v31 }
 0x140   :  { %992 = vmatmul.mubr.f32.gmra.mrb[10].mxu1 %v1478_v32 }
 0x141   :  { %994 = vmatprep.mubr.f32.mxu1 %v1480_v33 }
 0x144   :  { %995 = vmatmul.mubr.f32.gmra.mrb[12].mxu1 %v1484_v34 }
 0x145   :  { %997 = vmatprep.mubr.f32.mxu1 %v1486_v35 }
 0x148   :  { %998 = vmatmul.mubr.f32.gmra.mrb[14].mxu1 %v1490_v36 }
 0x149   :  { %1088 = vmatprep.mubr.f32.mxu1 %v1403_v40 }
 0x1ff   :  { %v978_v41 = vpop.f32.mrb[0].mxu1 }
 0x200   :  { %v290_v42 = vpop.f32.mrb[1].mxu1  ;;  %v370_v44 = vmax.f32 %v978_v41, 0.0 }
 0x201   :  { %v369_v43 = vmax.f32 %v290_v42, 0.0 }
 0x203   :  { %v981_v45 = vpop.f32.mrb[2].mxu1  ;;  %1032 = vmatprep.mubr.f32.mxu0 %v369_v43 }
 0x204   :  { %v300_v46 = vpop.f32.mrb[3].mxu1  ;;  %1033 = vmatmul.mubr.f32.vlgmr.msra.gmra.mrb[16].mxu0 %v370_v44  ;;  %v372_v47 = vmax.f32 %v981_v45, 0.0 }
 0x205   :  { %v371_v40 = vmax.f32 %v300_v46, 0.0 }
 0x207   :  { %v984_v48 = vpop.f32.mrb[4].mxu1  ;;  %1035 = vmatprep.mubr.f32.mxu0 %v371_v40 }
 0x208   :  { %v310_v49 = vpop.f32.mrb[5].mxu1  ;;  %1036 = vmatmul.mubr.f32.gmra.mrb[18].mxu0 %v372_v47  ;;  %v374_v51 = vmax.f32 %v984_v48, 0.0 }
 0x209   :  { %v373_v50 = vmax.f32 %v310_v49, 0.0 }
 0x20b   :  { %v987_v52 = vpop.f32.mrb[6].mxu1  ;;  %1038 = vmatprep.mubr.f32.mxu0 %v373_v50 }
 0x20c   :  { %v320_v53 = vpop.f32.mrb[7].mxu1  ;;  %1039 = vmatmul.mubr.f32.gmra.mrb[20].mxu0 %v374_v51  ;;  %v376_v55 = vmax.f32 %v987_v52, 0.0 }
 0x20d   :  { %v375_v54 = vmax.f32 %v320_v53, 0.0 }
 0x20f   :  { %v990_v56 = vpop.f32.mrb[8].mxu1  ;;  %1041 = vmatprep.mubr.f32.mxu0 %v375_v54 }
 0x210   :  { %v330_v57 = vpop.f32.mrb[9].mxu1  ;;  %1042 = vmatmul.mubr.f32.gmra.mrb[22].mxu0 %v376_v55  ;;  %v378_v59 = vmax.f32 %v990_v56, 0.0 }
 0x211   :  { %v377_v58 = vmax.f32 %v330_v57, 0.0 }
 0x213   :  { %v993_v60 = vpop.f32.mrb[10].mxu1  ;;  %1044 = vmatprep.mubr.f32.mxu0 %v377_v58 }
 0x214   :  { %v340_v61 = vpop.f32.mrb[11].mxu1  ;;  %1045 = vmatmul.mubr.f32.gmra.mrb[24].mxu0 %v378_v59  ;;  %v380_v63 = vmax.f32 %v993_v60, 0.0 }
 0x215   :  { %v379_v62 = vmax.f32 %v340_v61, 0.0 }
 0x217   :  { %v996_v0 = vpop.f32.mrb[12].mxu1  ;;  %1047 = vmatprep.mubr.f32.mxu0 %v379_v62 }
 0x218   :  { %v350_v1 = vpop.f32.mrb[13].mxu1  ;;  %1048 = vmatmul.mubr.f32.gmra.mrb[26].mxu0 %v380_v63  ;;  %v382_v3 = vmax.f32 %v996_v0, 0.0 }
 0x219   :  { %v381_v2 = vmax.f32 %v350_v1, 0.0 }
 0x21b   :  { %v999_v4 = vpop.f32.mrb[14].mxu1  ;;  %1050 = vmatprep.mubr.f32.mxu0 %v381_v2 }
 0x21c   :  { %v360_v5 = vpop.f32.mrb[15].mxu1  ;;  %1051 = vmatmul.mubr.f32.gmra.mrb[28].mxu0 %v382_v3  ;;  %v384_v7 = vmax.f32 %v999_v4, 0.0 }
 0x21d   :  { %v383_v6 = vmax.f32 %v360_v5, 0.0 }
 0x21f   :  { %1053 = vmatprep.mubr.f32.mxu0 %v383_v6 }
 0x220   :  { %1054 = vmatmul.mubr.f32.gmra.mrb[30].mxu0 %v384_v7 }
 0x2d7   :  { %v1034_v8 = vpop.f32.mrb[16].mxu0 }
 0x2d8   :  { %v499_v9 = vpop.f32.mrb[17].mxu0 }
 0x2d9   :  { %v1208_v10 = vpack.c.bf16 %v1034_v8, %v499_v9 }
 0x2db   :  { %v1037_v11 = vpop.f32.mrb[18].mxu0  ;;  %1209 = vmatprep.subr.bf16.mxu1 %v1208_v10 }
 0x2dc   :  { %v509_v12 = vpop.f32.mrb[19].mxu0  ;;  %1211 = vmatpush3.bf16.msra.mxu1 %v1208_v10 }
 0x2dd   :  { %v1212_v13 = vpack.c.bf16 %v1037_v11, %v509_v12 }
 0x2df   :  { %v1040_v14 = vpop.f32.mrb[20].mxu0  ;;  %1213 = vmatprep.subr.bf16.mxu1 %v1212_v13 }
 0x2e0   :  { %v519_v15 = vpop.f32.mrb[21].mxu0  ;;  %1215 = vmatpush3.bf16.msra.mxu1 %v1212_v13 }
 0x2e1   :  { %v1216_v16 = vpack.c.bf16 %v1040_v14, %v519_v15 }
 0x2e3   :  { %v1043_v17 = vpop.f32.mrb[22].mxu0  ;;  %1217 = vmatprep.subr.bf16.mxu1 %v1216_v16 }
 0x2e4   :  { %v529_v18 = vpop.f32.mrb[23].mxu0  ;;  %1219 = vmatpush3.bf16.msra.mxu1 %v1216_v16 }
 0x2e5   :  { %v1220_v19 = vpack.c.bf16 %v1043_v17, %v529_v18 }
 0x2e7   :  { %v1046_v20 = vpop.f32.mrb[24].mxu0  ;;  %1221 = vmatprep.subr.bf16.mxu1 %v1220_v19 }
 0x2e8   :  { %v539_v21 = vpop.f32.mrb[25].mxu0  ;;  %1223 = vmatpush3.bf16.msra.mxu1 %v1220_v19 }
 0x2e9   :  { %v1224_v37 = vpack.c.bf16 %v1046_v20, %v539_v21 }
 0x2eb   :  { %v1049_v38 = vpop.f32.mrb[26].mxu0  ;;  %1225 = vmatprep.subr.bf16.mxu1 %v1224_v37 }
 0x2ec   :  { %v549_v39 = vpop.f32.mrb[27].mxu0  ;;  %1227 = vmatpush3.bf16.msra.mxu1 %v1224_v37 }
 0x2ed   :  { %v1228_v41 = vpack.c.bf16 %v1049_v38, %v549_v39 }
 0x2ef   :  { %v1052_v42 = vpop.f32.mrb[28].mxu0  ;;  %1229 = vmatprep.subr.bf16.mxu1 %v1228_v41 }
 0x2f0   :  { %v559_v43 = vpop.f32.mrb[29].mxu0  ;;  %1231 = vmatpush3.bf16.msra.mxu1 %v1228_v41 }
 0x2f1   :  { %v1232_v44 = vpack.c.bf16 %v1052_v42, %v559_v43 }
 0x2f3   :  { %v1055_v45 = vpop.f32.mrb[30].mxu0  ;;  %1233 = vmatprep.subr.bf16.mxu1 %v1232_v44 }
 0x2f4   :  { %v569_v46 = vpop.f32.mrb[31].mxu0  ;;  %1235 = vmatpush3.bf16.msra.mxu1 %v1232_v44 }
 0x2f5   :  { %v1236_v40 = vpack.c.bf16 %v1055_v45, %v569_v46 }
 0x2f7   :  { %1237 = vmatprep.subr.bf16.mxu1 %v1236_v40 }
 0x2f8   :  { %1239 = vmatpush3.bf16.msra.mxu1 %v1236_v40 }
 0x2fb   :  { %1089 = vmatmul.mubr.f32.vlgmr.msra.gmra.mrb[16].mxu1 %v1448_v22 }
 0x2fc   :  { %1091 = vmatprep.mubr.f32.mxu1 %v1450_v23 }
 0x2ff   :  { %1092 = vmatmul.mubr.f32.gmra.mrb[18].mxu1 %v1454_v24 }
 0x300   :  { %1094 = vmatprep.mubr.f32.mxu1 %v1456_v25 }
 0x303   :  { %1095 = vmatmul.mubr.f32.gmra.mrb[20].mxu1 %v1460_v26 }
 0x304   :  { %1097 = vmatprep.mubr.f32.mxu1 %v1462_v27 }
 0x307   :  { %1098 = vmatmul.mubr.f32.gmra.mrb[22].mxu1 %v1466_v28 }
 0x308   :  { %1100 = vmatprep.mubr.f32.mxu1 %v1468_v29 }
 0x30b   :  { %1101 = vmatmul.mubr.f32.gmra.mrb[24].mxu1 %v1472_v30 }
 0x30c   :  { %1103 = vmatprep.mubr.f32.mxu1 %v1474_v31 }
 0x30f   :  { %1104 = vmatmul.mubr.f32.gmra.mrb[26].mxu1 %v1478_v32 }
 0x310   :  { %1106 = vmatprep.mubr.f32.mxu1 %v1480_v33 }
 0x313   :  { %1107 = vmatmul.mubr.f32.gmra.mrb[28].mxu1 %v1484_v34 }
 0x314   :  { %1109 = vmatprep.mubr.f32.mxu1 %v1486_v35 }
 0x317   :  { %1110 = vmatmul.mubr.f32.gmra.mrb[30].mxu1 %v1490_v36 }
 0x3ce   :  { %v1090_v22 = vpop.f32.mrb[16].mxu1 }
 0x3cf   :  { %740 = vst [vmem:[%s1567_s4 + $0x8] sm:$0xff] %v1090_v22  ;;  %v660_v23 = vpop.f32.mrb[17].mxu1 }
 0x3d0   :  { %739 = vst [vmem:[%s1567_s4] sm:$0xff] %v660_v23 }
 0x3d2   :  { %v1093_v24 = vpop.f32.mrb[18].mxu1 }
 0x3d3   :  { %742 = vst [vmem:[%s1567_s4 + $0x18] sm:$0xff] %v1093_v24  ;;  %v670_v25 = vpop.f32.mrb[19].mxu1 }
 0x3d4   :  { %741 = vst [vmem:[%s1567_s4 + $0x10] sm:$0xff] %v670_v25 }
 0x3d6   :  { %v1096_v26 = vpop.f32.mrb[20].mxu1 }
 0x3d7   :  { %744 = vst [vmem:[%s1567_s4 + $0x28] sm:$0xff] %v1096_v26  ;;  %v680_v27 = vpop.f32.mrb[21].mxu1 }
 0x3d8   :  { %743 = vst [vmem:[%s1567_s4 + $0x20] sm:$0xff] %v680_v27 }
 0x3da   :  { %v1099_v28 = vpop.f32.mrb[22].mxu1 }
 0x3db   :  { %746 = vst [vmem:[%s1567_s4 + $0x38] sm:$0xff] %v1099_v28  ;;  %v690_v29 = vpop.f32.mrb[23].mxu1 }
 0x3dc   :  { %745 = vst [vmem:[%s1567_s4 + $0x30] sm:$0xff] %v690_v29 }
 0x3de   :  { %v1102_v30 = vpop.f32.mrb[24].mxu1 }
 0x3df   :  { %748 = vst [vmem:[%s1567_s4 + $0x48] sm:$0xff] %v1102_v30  ;;  %v700_v31 = vpop.f32.mrb[25].mxu1 }
 0x3e0   :  { %747 = vst [vmem:[%s1567_s4 + $0x40] sm:$0xff] %v700_v31 }
 0x3e2   :  { %v1105_v32 = vpop.f32.mrb[26].mxu1 }
 0x3e3   :  { %750 = vst [vmem:[%s1567_s4 + $0x58] sm:$0xff] %v1105_v32  ;;  %v710_v33 = vpop.f32.mrb[27].mxu1 }
 0x3e4   :  { %749 = vst [vmem:[%s1567_s4 + $0x50] sm:$0xff] %v710_v33 }
 0x3e6   :  { %v1108_v34 = vpop.f32.mrb[28].mxu1 }
 0x3e7   :  { %752 = vst [vmem:[%s1567_s4 + $0x68] sm:$0xff] %v1108_v34  ;;  %v720_v35 = vpop.f32.mrb[29].mxu1 }
 0x3e8   :  { %751 = vst [vmem:[%s1567_s4 + $0x60] sm:$0xff] %v720_v35 }
 0x3ea   :  { %v1111_v36 = vpop.f32.mrb[30].mxu1 }
 0x3eb   :  { %754 = vst [vmem:[%s1567_s4 + $0x78] sm:$0xff] %v1111_v36  ;;  %v730_v47 = vpop.f32.mrb[31].mxu1 }
 0x3ec   :  { %753 = vst [vmem:[%s1567_s4 + $0x70] sm:$0xff] %v730_v47 }
 0x3ed   :  { %759 = vsyncpa [#allocation4], 1 }

</bundles_post_ra>
